<compile_context>
chip_gen: v6e
topology: v6e:2x2x1
jax: 0.10.0
libtpu: 0.0.40
codegen_flags: <defaults>
</compile_context>

<pallas_src>
import jax
import jax.numpy as jnp
from jax.experimental import pallas as pl
from jax.experimental.pallas import tpu as pltpu


def mimo_attn_kernel(qu_ref, k_ref, v_ref, w_ref, b_ref,
                     out_ref, attn_ref, attn_sc):
    j = pl.program_id(1)  # feature-chunk index

    # Attention weights depend only on (qu, k): compute once per batch step.
    @pl.when(j == 0)
    def _():
        qu = qu_ref[0]       # (Q, query_size)
        keys = k_ref[0]      # (K, key_size)

        # query = qu @ W + b   (torch nn.Linear; W stored as (in, out))
        query = jnp.dot(qu, w_ref[...],
                        preferred_element_type=jnp.float32) + b_ref[...]

        # logits[key, q] = <k[key], query[q]>  == bmm(k, query^T)
        logits = jnp.einsum("kd,qd->kq", keys, query,
                            preferred_element_type=jnp.float32)   # (K, Q)

        # softmax over the key axis (torch dim=1), numerically stable
        m = jnp.max(logits, axis=0, keepdims=True)
        e = jnp.exp(logits - m)
        attn = e / jnp.sum(e, axis=0, keepdims=True)               # (K, Q)

        attn_sc[...] = attn
        attn_ref[0] = attn.astype(attn_ref.dtype)

    # Weighted sum over keys for this feature chunk:
    #   out[q, f] = sum_key attn[key, q] * v[key, f]   (== attn^T @ v_chunk)
    out_ref[0] = jnp.einsum("kq,kf->qf", attn_sc[...], v_ref[0],
                            preferred_element_type=jnp.float32
                            ).astype(out_ref.dtype)


def _pick_feature_block(chw, max_block=512):
    """Largest multiple of 128 that divides chw and is <= max_block.

    Falls back to the full extent (always legal for a BlockSpec) when no such
    divisor exists or chw already fits the budget.
    """
    if chw <= max_block:
        return chw
    best = None
    t = 128
    while t <= max_block:
        if chw % t == 0:
            best = t
        t += 128
    return best if best is not None else chw


def mimo_attention_forward(qu, k, v, params, *, max_feature_block=512):
    """qu: (B, Q, query_size), k: (B, K, key_size), v: (B, K, C, H, W).

    Returns (output_sum (B, Q, C, H, W), attn_softmax (B, K, Q)) matching the
    PyTorch module's forward.
    """
    w, b = params
    B, Q, query_size = qu.shape
    _, K, key_size = k.shape
    _, _, C, H, Wsp = v.shape
    CHW = C * H * Wsp

    v_flat = v.reshape(B, K, CHW)            # lane-dense feature axis
    tf = _pick_feature_block(CHW, max_feature_block)
    n_feat = CHW // tf

    cost = pl.CostEstimate(
        flops=2 * B * (Q * query_size * key_size
                       + K * key_size * Q
                       + K * Q * CHW),
        transcendentals=B * K * Q,
        bytes_accessed=4 * (qu.size + k.size + v_flat.size + w.size + b.size
                            + B * Q * CHW + B * K * Q),
    )

    out_flat, attn = pl.pallas_call(
        mimo_attn_kernel,
        out_shape=(
            jax.ShapeDtypeStruct((B, Q, CHW), jnp.float32),
            jax.ShapeDtypeStruct((B, K, Q), jnp.float32),
        ),
        grid_spec=pltpu.PrefetchScalarGridSpec(
            num_scalar_prefetch=0,
            grid=(B, n_feat),
            in_specs=[
                pl.BlockSpec((1, Q, query_size), lambda i, j: (i, 0, 0)),
                pl.BlockSpec((1, K, key_size), lambda i, j: (i, 0, 0)),
                pl.BlockSpec((1, K, tf), lambda i, j: (i, 0, j)),      # streamed
                pl.BlockSpec((query_size, key_size), lambda i, j: (0, 0)),  # resident
                pl.BlockSpec((1, key_size), lambda i, j: (0, 0)),           # resident
            ],
            out_specs=(
                pl.BlockSpec((1, Q, tf), lambda i, j: (i, 0, j)),
                pl.BlockSpec((1, K, Q), lambda i, j: (i, 0, 0)),
            ),
            scratch_shapes=[pltpu.VMEM((K, Q), jnp.float32)],
        ),
        compiler_params=pltpu.CompilerParams(
            dimension_semantics=("parallel", "arbitrary"),
        ),
        cost_estimate=cost,
    )(qu, k, v_flat, w, b)

    return out_flat.reshape(B, Q, C, H, Wsp), attn


def init_params(key, query_size, key_size):
    """Deterministic synthetic Linear(query_size, key_size) params, (in, out) layout."""
    kw, kb = jax.random.split(key)
    bound = 1.0 / (query_size ** 0.5)
    w = jax.random.uniform(kw, (query_size, key_size), jnp.float32, -bound, bound)
    b = jax.random.uniform(kb, (1, key_size), jnp.float32, -bound, bound)
    return w, b


if __name__ == "__main__":
    # Small but consistent config: 2 batches, 8 keys (agents), 6 queries,
    # query_size=32, key_size=128, value feature maps (4, 16, 16).
    B, K, Q = 2, 8, 6
    query_size, key_size = 32, 128
    C, H, Wsp = 4, 16, 16

    root = jax.random.PRNGKey(0)
    kq, kk, kv, kp = jax.random.split(root, 4)
    qu = jax.random.normal(kq, (B, Q, query_size), jnp.float32)
    k = jax.random.normal(kk, (B, K, key_size), jnp.float32)
    v = jax.random.normal(kv, (B, K, C, H, Wsp), jnp.float32)
    params = init_params(kp, query_size, key_size)

    out, attn = mimo_attention_forward(qu, k, v, params)
    out = jax.block_until_ready(out)
    attn = jax.block_until_ready(attn)

    # Plain-JAX reference mirroring the torch forward.
    w, b = params
    query_ref = qu @ w + b                                   # Linear
    logits_ref = jnp.einsum("bkd,bqd->bkq", k, query_ref)    # bmm(k, query^T)
    attn_ref = jax.nn.softmax(logits_ref, axis=1)            # softmax over keys (dim=1)
    out_ref = jnp.einsum("bkq,bkchw->bqchw", attn_ref, v)    # weighted sum over keys

    assert out.shape == (B, Q, C, H, Wsp)
    assert attn.shape == (B, K, Q)
    assert jnp.allclose(attn, attn_ref, atol=1e-5, rtol=1e-5)
    assert jnp.allclose(out, out_ref, atol=1e-4, rtol=1e-4)
    print("KERNEL_OK")
</pallas_src>

<mosaic_0001>
module attributes {stable_mosaic.version = 11 : i64} {
  func.func @mimo_attn_kernel(%arg0: i32, %arg1: i32, %arg2: memref<1x6x32xf32, #tpu.memory_space<vmem>>, %arg3: memref<1x8x128xf32, #tpu.memory_space<vmem>>, %arg4: memref<1x8x512xf32, #tpu.memory_space<vmem>>, %arg5: memref<32x128xf32, #tpu.memory_space<vmem>>, %arg6: memref<1x128xf32, #tpu.memory_space<vmem>>, %arg7: memref<1x6x512xf32, #tpu.memory_space<vmem>>, %arg8: memref<1x8x6xf32, #tpu.memory_space<vmem>>, %arg9: memref<8x6xf32, #tpu.memory_space<vmem>>) attributes {dimension_semantics = [#tpu.dimension_semantics<parallel>, #tpu.dimension_semantics<arbitrary>], iteration_bounds = array<i64: 2, 2>, scalar_prefetch = 0 : i64, scratch_operands = 1 : i64, tpu.core_type = #tpu.core_type<tc>, window_params = [{transform_indices = @transform_0, window_bounds = array<i64: 1, 6, 32>}, {transform_indices = @transform_1, window_bounds = array<i64: 1, 8, 128>}, {transform_indices = @transform_2, window_bounds = array<i64: 1, 8, 512>}, {pipeline_mode = #tpu.pipeline_mode<synchronous>, transform_indices = @transform_3, window_bounds = array<i64: 32, 128>}, {pipeline_mode = #tpu.pipeline_mode<synchronous>, transform_indices = @transform_4, window_bounds = array<i64: 1, 128>}, {transform_indices = @transform_5, window_bounds = array<i64: 1, 6, 512>}, {transform_indices = @transform_6, window_bounds = array<i64: 1, 8, 6>}]} {
    %c0_i32 = arith.constant 0 : i32
    %0 = arith.cmpi eq, %arg1, %c0_i32 : i32
    %1 = arith.extui %0 : i1 to i32
    %c0_i32_0 = arith.constant 0 : i32
    %2 = arith.cmpi ne, %1, %c0_i32_0 : i32
    scf.if %2 {
      %c0_8 = arith.constant 0 : index
      %c0_9 = arith.constant 0 : index
      %c0_10 = arith.constant 0 : index
      %10 = vector.load %arg2[%c0_8, %c0_9, %c0_10] : memref<1x6x32xf32, #tpu.memory_space<vmem>>, vector<1x6x32xf32>
      %11 = vector.shape_cast %10 : vector<1x6x32xf32> to vector<6x32xf32>
      %c0_11 = arith.constant 0 : index
      %c0_12 = arith.constant 0 : index
      %c0_13 = arith.constant 0 : index
      %12 = vector.load %arg3[%c0_11, %c0_12, %c0_13] : memref<1x8x128xf32, #tpu.memory_space<vmem>>, vector<1x8x128xf32>
      %13 = vector.shape_cast %12 : vector<1x8x128xf32> to vector<8x128xf32>
      %c0_14 = arith.constant 0 : index
      %c0_15 = arith.constant 0 : index
      %14 = vector.load %arg5[%c0_14, %c0_15] : memref<32x128xf32, #tpu.memory_space<vmem>>, vector<32x128xf32>
      %cst_16 = arith.constant dense<0.000000e+00> : vector<6x128xf32>
      %15 = tpu.matmul %11, %14, %cst_16 {dimension_numbers = #tpu.dot_dimension_numbers<[1], [0], [0], [1], [0, 0, 1, 1], [], []>} : vector<6x32xf32>, vector<32x128xf32>, vector<6x128xf32> -> vector<6x128xf32>
      %c0_17 = arith.constant 0 : index
      %c0_18 = arith.constant 0 : index
      %16 = vector.load %arg6[%c0_17, %c0_18] : memref<1x128xf32, #tpu.memory_space<vmem>>, vector<1x128xf32>
      %17 = vector.broadcast %16 : vector<1x128xf32> to vector<6x128xf32>
      %18 = arith.addf %15, %17 : vector<6x128xf32>
      "tpu.trace_start"() <{level = 10 : i32, message = "kd,qd->kq"}> : () -> ()
      %cst_19 = arith.constant dense<0.000000e+00> : vector<8x6xf32>
      %19 = tpu.matmul %13, %18, %cst_19 {dimension_numbers = #tpu.dot_dimension_numbers<[1], [1], [0], [0], [0, 0, 1, 0], [], []>} : vector<8x128xf32>, vector<6x128xf32>, vector<8x6xf32> -> vector<8x6xf32>
      "tpu.trace_stop"() : () -> ()
      %cst_20 = arith.constant dense<0xFF800000> : vector<6xf32>
      %20 = vector.multi_reduction <maximumf>, %19, %cst_20 [0] : vector<8x6xf32> to vector<6xf32>
      %21 = vector.shape_cast %20 : vector<6xf32> to vector<1x6xf32>
      %22 = vector.broadcast %21 : vector<1x6xf32> to vector<8x6xf32>
      %23 = arith.subf %19, %22 : vector<8x6xf32>
      %24 = math.exp %23 : vector<8x6xf32>
      %cst_21 = arith.constant dense<0.000000e+00> : vector<6xf32>
      %25 = vector.multi_reduction <add>, %24, %cst_21 [0] : vector<8x6xf32> to vector<6xf32>
      %26 = vector.shape_cast %25 : vector<6xf32> to vector<1x6xf32>
      %27 = vector.broadcast %26 : vector<1x6xf32> to vector<8x6xf32>
      %28 = arith.divf %24, %27 : vector<8x6xf32>
      %c0_22 = arith.constant 0 : index
      %c0_23 = arith.constant 0 : index
      %29 = vector.load %arg9[%c0_22, %c0_23] : memref<8x6xf32, #tpu.memory_space<vmem>>, vector<8x6xf32>
      tpu.vector_store %arg9[%c0_22, %c0_23], %28 {strides = array<i32>} : memref<8x6xf32, #tpu.memory_space<vmem>>, vector<8x6xf32>,
      %c0_24 = arith.constant 0 : index
      %c0_25 = arith.constant 0 : index
      %c0_26 = arith.constant 0 : index
      %30 = vector.load %arg8[%c0_24, %c0_25, %c0_26] : memref<1x8x6xf32, #tpu.memory_space<vmem>>, vector<1x8x6xf32>
      %31 = vector.shape_cast %30 : vector<1x8x6xf32> to vector<8x6xf32>
      %32 = vector.shape_cast %28 : vector<8x6xf32> to vector<1x8x6xf32>
      tpu.vector_store %arg8[%c0_24, %c0_25, %c0_26], %32 {strides = array<i32>} : memref<1x8x6xf32, #tpu.memory_space<vmem>>, vector<1x8x6xf32>,
    } else {
    }
    %c0 = arith.constant 0 : index
    %c0_1 = arith.constant 0 : index
    %3 = vector.load %arg9[%c0, %c0_1] : memref<8x6xf32, #tpu.memory_space<vmem>>, vector<8x6xf32>
    %c0_2 = arith.constant 0 : index
    %c0_3 = arith.constant 0 : index
    %c0_4 = arith.constant 0 : index
    %4 = vector.load %arg4[%c0_2, %c0_3, %c0_4] : memref<1x8x512xf32, #tpu.memory_space<vmem>>, vector<1x8x512xf32>
    %5 = vector.shape_cast %4 : vector<1x8x512xf32> to vector<8x512xf32>
    "tpu.trace_start"() <{level = 10 : i32, message = "kq,kf->qf"}> : () -> ()
    %cst = arith.constant dense<0.000000e+00> : vector<6x512xf32>
    %6 = tpu.matmul %3, %5, %cst {dimension_numbers = #tpu.dot_dimension_numbers<[0], [0], [1], [1], [0, 1, 1, 1], [], []>} : vector<8x6xf32>, vector<8x512xf32>, vector<6x512xf32> -> vector<6x512xf32>
    "tpu.trace_stop"() : () -> ()
    %c0_5 = arith.constant 0 : index
    %c0_6 = arith.constant 0 : index
    %c0_7 = arith.constant 0 : index
    %7 = vector.load %arg7[%c0_5, %c0_6, %c0_7] : memref<1x6x512xf32, #tpu.memory_space<vmem>>, vector<1x6x512xf32>
    %8 = vector.shape_cast %7 : vector<1x6x512xf32> to vector<6x512xf32>
    %9 = vector.shape_cast %6 : vector<6x512xf32> to vector<1x6x512xf32>
    tpu.vector_store %arg7[%c0_5, %c0_6, %c0_7], %9 {strides = array<i32>} : memref<1x6x512xf32, #tpu.memory_space<vmem>>, vector<1x6x512xf32>,
    return
  }
  func.func @transform_0(%arg0: i32, %arg1: i32) -> (i32, i32, i32) {
    %c0_i32 = arith.constant 0 : i32
    %c0_i32_0 = arith.constant 0 : i32
    %c0_i32_1 = arith.constant 0 : i32
    return %arg0, %c0_i32, %c0_i32_0 : i32, i32, i32
  }
  func.func @transform_1(%arg0: i32, %arg1: i32) -> (i32, i32, i32) {
    %c0_i32 = arith.constant 0 : i32
    %c0_i32_0 = arith.constant 0 : i32
    %c0_i32_1 = arith.constant 0 : i32
    return %arg0, %c0_i32, %c0_i32_0 : i32, i32, i32
  }
  func.func @transform_2(%arg0: i32, %arg1: i32) -> (i32, i32, i32) {
    %c0_i32 = arith.constant 0 : i32
    %c0_i32_0 = arith.constant 0 : i32
    return %arg0, %c0_i32, %arg1 : i32, i32, i32
  }
  func.func @transform_3(%arg0: i32, %arg1: i32) -> (i32, i32) {
    %c0_i32 = arith.constant 0 : i32
    %c0_i32_0 = arith.constant 0 : i32
    %c0_i32_1 = arith.constant 0 : i32
    return %c0_i32, %c0_i32_0 : i32, i32
  }
  func.func @transform_4(%arg0: i32, %arg1: i32) -> (i32, i32) {
    %c0_i32 = arith.constant 0 : i32
    %c0_i32_0 = arith.constant 0 : i32
    %c0_i32_1 = arith.constant 0 : i32
    return %c0_i32, %c0_i32_0 : i32, i32
  }
  func.func @transform_5(%arg0: i32, %arg1: i32) -> (i32, i32, i32) {
    %c0_i32 = arith.constant 0 : i32
    %c0_i32_0 = arith.constant 0 : i32
    return %arg0, %c0_i32, %arg1 : i32, i32, i32
  }
  func.func @transform_6(%arg0: i32, %arg1: i32) -> (i32, i32, i32) {
    %c0_i32 = arith.constant 0 : i32
    %c0_i32_0 = arith.constant 0 : i32
    %c0_i32_1 = arith.constant 0 : i32
    return %arg0, %c0_i32, %c0_i32_0 : i32, i32, i32
  }
}

</mosaic_0001>

<bundles_post_ra>
// kernel: tpu_custom_call.1
= control target key start
LH: loop header
LB: loop body
LE: loop exit
PB: predicated region body
PF: predicated region fallthrough
CT: control target
= control target key end

     0   :  { %s1499_s0 = inlined_call_operand.vmem [shape: f32[2,6,32], index: 0, kind: input, shape index: {}]   ;;  %s1500_s1 = inlined_call_operand.hbm [shape: f32[2,8,128], index: 1, kind: input, shape index: {}]   ;;  %s1501_s2 = inlined_call_operand.hbm [shape: f32[2,8,1024], index: 2, kind: input, shape index: {}]   ;;  %s1502_s3 = inlined_call_operand.vmem [shape: f32[32,128], index: 3, kind: input, shape index: {}]   ;;  %s1503_s4 = inlined_call_operand.vmem [shape: f32[1,128], index: 4, kind: input, shape index: {}]   ;;  %s1504_s5 = inlined_call_operand.vmem [shape: f32[2,6,1024], index: 5, kind: output, shape index: {0}]   ;;  %s1505_s6 = inlined_call_operand.vmem [shape: f32[2,8,6], index: 6, kind: output, shape index: {1}]  }
   0x1   :  { %1512 = sst [smem:[#allocation13_spill]] %s1499_s0 }
   0x2   :  { %1513 = sst [smem:[#allocation14_spill]] %s1500_s1 }
   0x3   :  { %1514 = sst [smem:[#allocation15_spill]] %s1502_s3 }
   0x4   :  { %1515 = sst [smem:[#allocation16_spill]] %s1503_s4 }
   0x5   :  { %1516 = sst [smem:[#allocation17_spill]] %s1504_s5 }
   0x6   :  { %1517 = sst [smem:[#allocation18_spill]] %s1505_s6 }
   0x7   :  { %12 = vsyncpa [#allocation4], 0 }
   0x8   :  { %14 = vsyncpa [#allocation4 + $0x1], 0 }
   0x9   :  { %15 = vsyncpa [#allocation6], 0 }
   0xa   :  { %17 = vsyncpa [#allocation6 + $0x1], 0  ;;  %s1244_s21 = smov 0   ;;  %s1246_s22 = smov 0  }
   0xb   :  { %s1248_s23 = smov 0   ;;  %s1250_s24 = smov 0  }
   0xc   :  { %s1252_s25 = smov 0   ;;  %s1254_s26 = smov 0  }
   0xd   :  { %s1256_s27 = smov 0   ;;  %s1258_s28 = smov 0  }
   0xe   :  { %s1260_s29 = smov 0   ;;  %s1262_s30 = smov 0  }
   0xf   :  { %s1264_s7 = smov 0  }
  0x10 LB: > { %1518 = sst [smem:[#allocation9_spill]] %s1186_s27  ;;  %s897_s8 = sadd.s32 4294967295, %s1202_s7   ;;  %s1202_s7 = sphi %s1264_s7, %s23_s7   ;;  %s1198_s30 = sphi %s1262_s30, %s1551_s30   ;;  %s1194_s29 = sphi %s1260_s29, %s1550_s29   ;;  %s1190_s28 = sphi %s1258_s28, %s1549_s28   ;;  %s1186_s27 = sphi %s1256_s27, %s1548_s27   ;;  %s1182_s26 = sphi %s1254_s26, %s1547_s26   ;;  %s1178_s25 = sphi %s1252_s25, %s1546_s25   ;;  %s1174_s24 = sphi %s1250_s24, %s1545_s24   ;;  %s1170_s23 = sphi %s1248_s23, %s1544_s23   ;;  %s1166_s22 = sphi %s1246_s22, %s1543_s22   ;;  %s1162_s21 = sphi %s1244_s21, %s1542_s21  }
  0x11   : > { %1519 = sst [smem:[#allocation10_spill]] %s1190_s28  ;;  %s35_s9 = sadd.s32 1, %s1198_s30 }
  0x12   : > { %p75_p0 = scmp.ne.s32.totalorder %s1182_s26, %s1178_s25  ;;  %p76_p1 = scmp.eq.s32.totalorder %s1202_s7, 0 }
  0x13   : > { %p81_p2 = scmp.ne.s32.totalorder %s1178_s25, %s1174_s24  ;;  %p1303_p3 = scmp.eq.s32.totalorder %s897_s8, 0 }
  0x14   : > { %p77_p4 = por %p76_p1, %p75_p0  ;;  %p1506_p5 = scmp.lt.s32.totalorder %s1202_s7, 4 }
  0x15   : > { %p1312_p6 = por %p1303_p3, %p81_p2  ;;  %s242_s12 = sand.u32 1, %s1182_s26  }
  0x16   : > { %s901_s13 = sshll.u32 %s242_s12, 3  ;;  %s902_s14 = sshll.u32 %s1198_s30, 7 }
  0x17   : > { %s1522_s1 = sld [smem:[#allocation14_spill]]  ;;  %s246_s18 = scalar_lea.vmem [#allocation3], %s901_s13 }
  0x18   : > { %s253_s19 = sshll.u32 %s246_s18, 4  ;;  %p1323_p7 = pnand %p1506_p5, %p77_p4  ;;  %s254_s19 = int_to_ptr.vmem [resolvable:$true] %s253_s19 }
  0x19   : > { %p907_p8 = scmp.ge.s32.totalorder %s1202_s7, 1  ;;  %p279_p9 = scmp.lt.s32.totalorder %s1202_s7, 5 }
  0x1a   : > { %s243_s24 = scalar_lea.sflag [#allocation4], %s242_s12  ;;  %p1054_p10 = pneg %p1323_p7 }
  0x1b   : > { %s1065_s8 = scalar_lea.vmem %s254_s19, 128  ;;  %s1204_s15 = smov [#allocation3]  }
  0x1c   : > { %p1066_p11 = scmp.ne.s32.totalorder %s254_s19, %s1065_s8 }
  0x1d   : > { %s251_s17 = scalar_lea.hbm %s1522_s1, %s902_s14  ;;  %s1070_s14 = sshll.u32 %s1204_s15, 4  ;;  %s1071_s14 = int_to_ptr.vmem [resolvable:$false] %s1070_s14 }
  0x1e   : > { %p1068_p12 = pnand %p1066_p11, %p1054_p10  ;;  %s1072_s13 = scalar_lea.vmem %s1071_s14, 256 }
  0x1f   : > { %p1073_p0 = scmp.lt.s32.totalorder %s254_s19, %s1071_s14  ;;  %p1074_p2 = scmp.lt.s32.totalorder %s1072_s13, %s1065_s8 }
  0x20   : > { %p1069_p13 = pneg %p1068_p12 }
  0x21   : > { %p1075_p4 = por %p1074_p2, %p1073_p0 }
  0x23   : > { %p1076_p5 = pnand %p1075_p4, %p1069_p13 }
  0x25   : > { %1079 = shalt.err (!%p1076_p5)
}
  0x26   : > { %952 = dma.hbm_to_vmem [thread:$0]  (!%p1323_p7), %s251_s17, 128, %s254_s19, %s243_s24  }
  0x27   : > { %p1337_p5 = pnand %p907_p8, %p279_p9  ;;  %s68_s16 = sadd.s32 1, %s1182_s26 }
  0x28   : > { %s32_s18 = sadd.s32 1, %s1194_s29  ;;  %p103_p11 = scmp.ne.s32.totalorder %s1170_s23, %s1166_s22 }
  0x29   : > { %p33_p10 = scmp.ge.s32.totalorder %s32_s18, 2  ;;  %p109_p12 = scmp.ne.s32.totalorder %s1166_s22, %s1162_s21 }
  0x2a   : > { %s260_s20 = sand.u32 1, %s1170_s23   ;;  %s96_s19 = sadd.s32 1, %s1170_s23 }
  0x2b   : > { %s1553_s18 = smov (%p33_p10, %s32_s18), 0  ;;  %s1555_s9 = smov (!%p33_p10, %s35_s9), %s1198_s30 }
  0x2c   : > { %1525 = sst [smem:[#allocation11_spill]] %s1553_s18  ;;  %s92_s17 = ssub.s32 %s1194_s29, %s1553_s18 }
  0x2d   : > { %p37_p7 = scmp.ge.s32.totalorder %s1555_s9, 2  ;;  %p1358_p8 = por %p109_p12, %p1303_p3 }
  0x2e   : > { %p1364_p9 = por %p103_p11, %p76_p1  ;;  %s903_s21 = sshll.u32 %s260_s20, 5 }
  0x2f   : > { %s1557_s9 = smov (%p37_p7, %s1555_s9), 0  ;;  %s904_s15 = sshll.u32 %s1194_s29, 2 }
  0x30   : > { %1528 = sst [smem:[#allocation12_spill]] %s1557_s9  ;;  %s65_s14 = ssub.s32 %s1198_s30, %s1557_s9 }
  0x31   : > { %s905_s13 = sshll.u32 %s1198_s30, 3  ;;  %p66_p13 = scmp.eq.s32.totalorder %s65_s14, 0 }
  0x32   : > { %s93_s10 = sor.u32 %s92_s17, %s65_s14  ;;  %s270_s1 = sadd.s32 %s905_s13, %s904_s15 }
  0x33   : > { %p94_p3 = scmp.eq.s32.totalorder %s93_s10, 0  ;;  %s906_s3 = sshll.u32 %s270_s1, 7 }
  0x34   : > { %s1375_s18 = scalar_select %p66_p13, %s1182_s26, %s68_s16  }
  0x35   : > { %s1378_s4 = scalar_select %p94_p3, %s1170_s23, %s96_s19  }
  0x36   : > { %s264_s5 = scalar_lea.vmem [#allocation5], %s903_s21  ;;  %s272_s28 = scalar_lea.hbm %s1501_s2, %s906_s3 }
  0x37   : > { %s274_s6 = sshll.u32 %s264_s5, 4  ;;  %p1529_p1 = scmp.lt.s32.totalorder %s1202_s7, 4  ;;  %s275_s6 = int_to_ptr.vmem [resolvable:$true] %s274_s6 }
  0x38   : > { %s261_s17 = scalar_lea.sflag [#allocation6], %s260_s20  ;;  %s1093_s16 = scalar_lea.vmem %s275_s6, 512 }
  0x39   : > { %p1387_p0 = pnand %p1529_p1, %p1364_p9  ;;  %p1094_p4 = scmp.ne.s32.totalorder %s275_s6, %s1093_s16 }
  0x3a   : > { %s1205_s1 = smov [#allocation5]  }
  0x3b   : > { %p1082_p2 = pneg %p1387_p0  ;;  %s1098_s5 = sshll.u32 %s1205_s1, 4  ;;  %s1099_s5 = int_to_ptr.vmem [resolvable:$false] %s1098_s5 }
  0x3c   : > { %s1100_s0 = scalar_lea.vmem %s1099_s5, 1024  ;;  %p1101_p12 = scmp.lt.s32.totalorder %s275_s6, %s1099_s5 }
  0x3d   : > { %p1096_p10 = pnand %p1094_p4, %p1082_p2  ;;  %p1102_p7 = scmp.lt.s32.totalorder %s1100_s0, %s1093_s16 }
  0x3f   : > { %p1097_p11 = pneg %p1096_p10  ;;  %p1103_p13 = por %p1102_p7, %p1101_p12 }
  0x41   : > { %p1104_p3 = pnand %p1103_p13, %p1097_p11 }
  0x43   : > { %1107 = shalt.err (!%p1104_p3)
}
  0x44   : > { %955 = dma.hbm_to_vmem [thread:$0]  (!%p1387_p0), %s272_s28, 512, %s275_s6, %s261_s17  }
  0x45   : > { %283 = sbr.rel (%p1337_p5) target bundleno = 885 (0x375), region = 40  ;;  %s285_s3 = sand.u32 (!%p1337_p5), 1, %s1178_s25  }
  0x46   : > { %s1398_s27 = sshll.u32 (!%p1337_p5), %s285_s3, 3  ;;  %s286_s20 = scalar_lea.sflag (!%p1337_p5), [#allocation4], %s285_s3 }
  0x4a   : > { %1153 = dma.done.wait (%p1312_p6), %s286_s20, 128  }
  0x4b   : > { %1155 = vsyncadd (%p1312_p6), %s286_s20, 4294967168  ;;  %s294_s9 = sand.u32 1, %s1166_s22  }
  0x4c   : > { %s909_s6 = sshll.u32 %s294_s9, 5  ;;  %s295_s28 = scalar_lea.sflag [#allocation6], %s294_s9 }
  0x4d   : > { %s1406_s12 = scalar_lea.vmem [#allocation5], %s909_s6 }
  0x4e   : > { %1157 = dma.done.wait (%p1358_p8), %s295_s28, 512  }
  0x4f   : > { %1159 = vsyncadd (%p1358_p8), %s295_s28, 4294966784  ;;  %s1531_s8 = sld [smem:[#allocation10_spill]] }
  0x50   : > { %s1532_s21 = sld [smem:[#allocation9_spill]] }
  0x51   : > { %s1533_s10 = sld [smem:[#allocation13_spill]] }
  0x52   : > { %s1534_s0 = sld [smem:[#allocation18_spill]] }
  0x53   : > { %s1535_s6 = sld [smem:[#allocation17_spill]] }
  0x55   : > { %p344_p5 = scmp.lt.s32.totalorder %s1531_s8, 1 }
  0x56   : > { %s911_s15 = sshll.u32 %s1532_s21, 2  ;;  %p915_p6 = scmp.ne.s32.totalorder %s1532_s21, 0 }
  0x57   : > { %p352_p9 = scmp.lt.s32.totalorder %s911_s15, 7  ;;  %s1559_s8 = smov (!%p344_p5, %s1531_s8), 1 }
  0x58   : > { %s1415_s11 = sshll.u32 %s1559_s8, 3  ;;  %366 = sbr.rel (%p915_p6) target bundleno = 557 (0x22d), region = 52 }
  0x59   : > { %s1561_s15 = smov (!%p352_p9, %s911_s15), 7  ;;  %s347_s17 = scalar_lea.vmem %s1533_s10, %s1415_s11 }
  0x5a   : > { %s355_s16 = sadd.s32 %s1415_s11, %s1561_s15  ;;  %s362_s3 = scalar_lea.vmem %s1534_s0, %s1415_s11 }
  0x5b   : > { %s913_s24 = sshll.u32 %s355_s16, 3  ;;  %s1536_s14 = sld [smem:[#allocation15_spill]] (!%p915_p6) }
  0x5c   : > { %s1429_s28 = scalar_lea.vmem %s1535_s6, %s913_s24  ;;  %s1537_s5 = sld [smem:[#allocation16_spill]] (!%p915_p6) }
  0x5d   : > { %v1206_v1 = vmov 0.0   ;;  %vm1207_vm0 = vmmov 0   ;;  %v367_v5 = vld [vmem:[%s347_s17] sm:$0x3f]  ;;  %vm380_vm1 = vcmask 261120   ;;  %s1538_s0 = scalar_lea.vmem [#allocation3], %s1398_s27 }
  0x5e   : > { %929 = vmatprep.subr.mxu0 %v1206_v1  ;;  %937 = vmatprep.mubr.msk.f32.mxu0 %vm1207_vm0, %v1206_v1  ;;  %v368_v10 = vld [vmem:[%s1538_s0] sm:$0xff]  ;;  %vm524_vm2 = vcmask 48128  }
  0x5f   : > { %940 = vmatprep.subr.mxu1 %v1206_v1  ;;  %942 = vmatprep.mubr.msk.f32.mxu1 %vm1207_vm0, %v1206_v1 }
  0x61   : > { %v372_v0 = vld [vmem:[%s1536_s14 + $0x18] sm:$0xff]  ;;  %v371_v2 = vld [vmem:[%s1536_s14 + $0x10] sm:$0xff]  ;;  %v370_v3 = vld [vmem:[%s1536_s14 + $0x8] sm:$0xff] }
  0x62   : > { %930 = vmatpush3.msra.mxu0 %v372_v0  ;;  %v369_v4 = vld [vmem:[%s1536_s14] sm:$0xff] }
  0x63   : > { %931 = vmatprep.subr.mxu0 %v1206_v1  ;;  %v916_v6 = vld [vmem:[%s1537_s5] ss:$0 sm:$0xff] }
  0x64   : > { %932 = vmatpush3.msra.mxu0 %v371_v2 }
  0x65   : > { %933 = vmatprep.subr.mxu0 %v1206_v1 }
  0x66   : > { %934 = vmatpush3.msra.mxu0 %v370_v3 }
  0x67   : > { %935 = vmatprep.subr.mxu0 %v1206_v1 }
  0x68   : > { %936 = vmatpush3.msra.mxu0 %v369_v4 }
  0x69   : > { %938 = vmatmul.mubr.msk.f32.vlgmr.msra.gmra.mxu0 %vm380_vm1, %v367_v5 }
 0x129   : > { %v450_v7 = vpop.f32.mrf.mxu0 }
 0x12a   : > { %v451_v8 = vadd.f32 %v916_v6, %v450_v7 }
 0x12b   : > { %v939_v9 = vpop.f32.mrf.mxu0 }
 0x12c   : > { %941 = vmatpush3.xpose.msra.mxu1 %v451_v8 }
 0x12f   : > { %943 = vmatmul.mubr.f32.vlgmr.msra.gmra.mxu1 %v368_v10 }
 0x1ef   : > { %v520_v11 = vpop.f32.mrf.mxu1 }
 0x1f0   : > { %v525_v12 = vsel %vm524_vm2, %v520_v11, -inf }
 0x1f1   : > { %v526_v13 = vrot.slane %v525_v12, 4  ;;  %v944_v14 = vpop.f32.mrf.mxu1 }
 0x1f3   : > { %v527_v15 = vmax.f32 %v525_v12, %v526_v13 }
 0x1f5   : > { %v528_v16 = vrot.slane %v527_v15, 2 }
 0x1f7   : > { %v529_v17 = vmax.f32 %v527_v15, %v528_v16 }
 0x1f9   : > { %v530_v18 = vrot.slane %v529_v17, 1 }
 0x1fb   : > { %v531_v19 = vmax.f32 %v529_v17, %v530_v18 }
 0x1fd   : > { %v532_v20 = vsub.f32 %v520_v11, %v531_v19 }
 0x1ff   : > { %v533_v21 = vmul.f32 1.442695, %v532_v20 }
 0x201   : > { %1048 = vpow2.f32 %v533_v21 }
 0x20e   : > { %v1049_v22 = vpop.eup %1048 }
 0x20f   : > { %v535_v23 = vsel %vm524_vm2, %v1049_v22, 0.0 }
 0x210   : > { %v536_v24 = vrot.slane %v535_v23, 4 }
 0x212   : > { %v537_v25 = vadd.f32 %v536_v24, %v535_v23 }
 0x214   : > { %v538_v26 = vrot.slane %v537_v25, 2 }
 0x216   : > { %v539_v27 = vadd.f32 %v538_v26, %v537_v25 }
 0x218   : > { %v540_v28 = vrot.slane %v539_v27, 1 }
 0x21a   : > { %v541_v29 = vadd.f32 %v540_v28, %v539_v27 }
 0x21c   : > { %1050 = vrcp.f32 %v541_v29 }
 0x229   : > { %v1051_v30 = vpop.eup %1050 }
 0x22a   : > { %v543_v31 = vmul.f32 %v1051_v30, %v1049_v22 }
 0x22c   : > { %544 = vst.msk [vmem:[#allocation2] sm:$0xff] %vm524_vm2, %v543_v31  ;;  %545 = vst.msk [vmem:[%s362_s3] sm:$0xff] %vm524_vm2, %v543_v31 }
 0x22d PF: > { %v548_v33 = vld [vmem:[%s1406_s12 + $0x8] sm:$0xff]  ;;  %v550_v34 = vld [vmem:[%s1406_s12 + $0x18] sm:$0xff]  ;;  %v547_v35 = vld [vmem:[%s1406_s12] sm:$0xff]  ;;  %v1208_v37 = vmov 0.0   ;;  %vm583_vm3 = vcmask 64512  }
 0x22e   : > { %617 = vmatprep.subr.mxu0 %v548_v33  ;;  %v549_v36 = vld [vmem:[%s1406_s12 + $0x10] sm:$0xff]  ;;  %688 = vmatprep.subr.mxu1 %v550_v34 }
 0x22f   : > { %618 = vmatpush1.msra.mxu0 %v547_v35  ;;  %651 = vmatprep.mubr.f32.mxu0 %v1208_v37 }
 0x230   : > { %689 = vmatpush1.msra.mxu1 %v549_v36  ;;  %722 = vmatprep.mubr.f32.mxu1 %v1208_v37 }
 0x233   : > { %v546_v32 = vld [vmem:[#allocation2] sm:$0xff] }
 0x234   : > { %551 = vxpose.xlu0.b32.start.end [1/1] (short) (narrow) %v546_v32, 8 }
 0x2b0   : > { %v567_v38 = vpop.trf.xlu0 }
 0x2b1   : > { %918 = vmatmul.mubr.msk.f32.vlgmr.msra.gmra.mxu0 %vm583_vm3, %v567_v38  ;;  %919 = vmatmul.mubr.msk.f32.vlgmr.msra.gmra.mxu1 %vm583_vm3, %v567_v38 }
 0x371   : > { %v653_v39 = vpop.f32.mrf.mxu0  ;;  %v724_v40 = vpop.f32.mrf.mxu1 }
 0x372   : > { %729 = vst [vmem:[%s1429_s28] sm:$0x3f] %v653_v39  ;;  %731 = vst [vmem:[%s1429_s28 + $0x10] sm:$0x3f] %v724_v40 }
 0x373   : > { %v655_v41 = vpop.f32.mrf.mxu0  ;;  %v726_v42 = vpop.f32.mrf.mxu1 }
 0x374   : > { %730 = vst [vmem:[%s1429_s28 + $0x8] sm:$0x3f] %v655_v41  ;;  %732 = vst [vmem:[%s1429_s28 + $0x18] sm:$0x3f] %v726_v42 }
 0x375 PF: > { %s23_s7 = sadd.s32 1, %s1202_s7   ;;  %s1540_s12 = sld [smem:[#allocation11_spill]] }
 0x376   : > { %p20_p8 = scmp.ge.s32.totalorder %s23_s7, 6   ;;  %s1541_s11 = sld [smem:[#allocation12_spill]] }
 0x377   : > { %s1542_s21 = smov %s1166_s22  ;;  %s1543_s22 = smov %s1170_s23 }
 0x378   : > { %s1544_s23 = smov %s1378_s4  ;;  %s1545_s24 = smov %s1178_s25 }
 0x379   : > { %s1546_s25 = smov %s1182_s26  ;;  %s1547_s26 = smov %s1375_s18 }
 0x37a   : > { %s1548_s27 = smov %s1194_s29  ;;  %s1549_s28 = smov %s1198_s30 }
 0x37b   : > { %s1550_s29 = smov %s1540_s12  ;;  %22 = sbr.rel (!%p20_p8) target bundleno = 16 (0x10), region = 112 }
 0x37c   : > { %s1551_s30 = smov %s1541_s11 }
 0x380   :  { %777 = vsyncpa [#allocation4], 1 }
 0x381   :  { %779 = vsyncpa [#allocation4 + $0x1], 1 }
 0x382   :  { %780 = vsyncpa [#allocation6], 1 }
 0x383   :  { %782 = vsyncpa [#allocation6 + $0x1], 1 }

</bundles_post_ra>
